<compile_context>
chip_gen: v7x
topology: tpu7x:2x2x1
jax: 0.10.0
libtpu: 0.0.40
codegen_flags: <defaults>
</compile_context>

<pallas_src>
import math

import jax
import jax.numpy as jnp
from jax.experimental import pallas as pl
from jax.experimental.pallas import tpu as pltpu


def _round_up(x, m):
    return ((x + m - 1) // m) * m


def _ceil_div(a, b):
    return -(-a // b)


def _temp_embed_kernel(t_ref, sfreq_ref, fbias_ref, w1c_ref, w1s_ref, b1_ref,
                       w2_ref, b2_ref, o_ref):
    # t_ref     : (TN, 1)      f32 -- raw temperatures (batch tile)
    # sfreq_ref : (1, half)    f32 -- freqs * (1000 / (max - min))
    # fbias_ref : (1, half)    f32 -- freqs * (-min * 1000 / (max - min))
    # w1c_ref   : (half, H)    f32 -- W1 rows pairing with cos
    # w1s_ref   : (half, H)    f32 -- W1 rows pairing with sin
    # b1_ref    : (1, H)       f32
    # w2_ref    : (H, E)       f32
    # b2_ref    : (1, E)       f32
    # o_ref     : (TN, E)      out dtype
    t = t_ref[...]                                               # (TN, 1)

    # Sinusoidal embedding args with the temperature scaler pre-folded in.
    args = t * sfreq_ref[...] + fbias_ref[...]                   # (TN, half)

    cos_e = jnp.cos(args)
    sin_e = jnp.sin(args)

    # Linear1 on [cos | sin] without materializing the concat: two K=half
    # dots against the pre-split W1 halves, f32 accumulation on the MXU.
    h = (jnp.dot(cos_e, w1c_ref[...], preferred_element_type=jnp.float32)
         + jnp.dot(sin_e, w1s_ref[...], preferred_element_type=jnp.float32)
         + b1_ref[...])                                          # (TN, H)

    # SiLU with a single transcendental (logistic on the EUP).
    h = h * jax.nn.sigmoid(h)

    out = (jnp.dot(h, w2_ref[...], preferred_element_type=jnp.float32)
           + b2_ref[...])                                        # (TN, E)
    o_ref[...] = out.astype(o_ref.dtype)


def temperature_embedder_sinusoidal(T, w1, b1, w2, b2, *, t_min, t_max,
                                    freq_dim=256, max_period=10000.0,
                                    block_rows=2048,
                                    out_dtype=jnp.float32):
    """T: (N,) f32 temperatures -> (N, embed_dim) embeddings.

    w1: (freq_dim, hidden), b1: (hidden,), w2: (hidden, embed_dim),
    b2: (embed_dim,) stored as (in, out); x @ W + b == PyTorch nn.Linear.
    """
    assert t_max != t_min, "scaler max must differ from min (division by zero)"
    N = T.shape[0]
    hidden = w1.shape[1]
    out_dim = w2.shape[1]
    half = freq_dim // 2
    assert freq_dim % 2 == 0 and w1.shape[0] == freq_dim and w2.shape[0] == hidden
    # TODO(synk): odd freq_dim (zero-pad column) and mode="scaler" (Linear(1, E))
    # are trivial variants of this kernel and are not implemented here.

    # Host/XLA-side precompute: frequency table folded with the temperature
    # scaler (removes per-grid-step iota/exp and the scaler VPU ops).
    scale = 1000.0 / float(t_max - t_min)
    freqs = jnp.exp(-math.log(max_period)
                    * jnp.arange(half, dtype=jnp.float32) / half)     # (half,)
    scaled_freqs = (freqs * scale).reshape(1, half)
    freq_bias = (freqs * (-float(t_min) * scale)).reshape(1, half)

    t2d = T.reshape(N, 1).astype(jnp.float32)
    # W1 split at the host boundary: zero-cost kernel operands for any freq_dim.
    w1_cos = w1[:half, :].astype(jnp.float32)
    w1_sin = w1[half:, :].astype(jnp.float32)
    w2c = w2.astype(jnp.float32)
    b1r = b1.reshape(1, hidden).astype(jnp.float32)
    b2r = b2.reshape(1, out_dim).astype(jnp.float32)

    # Batch tile: as large as sensible (multiple of 8 sublanes).  If the whole
    # batch would fit in one tile, split into >=2 steps so the "parallel" axis
    # can shard across v7x's 2 TensorCores (one extra ~0.35 us step elsewhere).
    TN = min(block_rows, _round_up(N, 8))
    if N > 8 and _ceil_div(N, TN) < 2:
        TN = max(8, _round_up(_ceil_div(N, 2), 8))
    grid = (pl.cdiv(N, TN),)

    resident = lambda i: (0, 0)   # weights / tables stay put across the grid

    return pl.pallas_call(
        _temp_embed_kernel,
        out_shape=jax.ShapeDtypeStruct((N, out_dim), out_dtype),
        grid=grid,
        in_specs=[
            pl.BlockSpec((TN, 1), lambda i: (i, 0)),        # temperatures
            pl.BlockSpec((1, half), resident),              # scaled freqs
            pl.BlockSpec((1, half), resident),              # freq bias
            pl.BlockSpec((half, hidden), resident),         # W1 (cos half)
            pl.BlockSpec((half, hidden), resident),         # W1 (sin half)
            pl.BlockSpec((1, hidden), resident),            # b1
            pl.BlockSpec((hidden, out_dim), resident),      # W2
            pl.BlockSpec((1, out_dim), resident),           # b2
        ],
        out_specs=pl.BlockSpec((TN, out_dim), lambda i: (i, 0)),
        compiler_params=pltpu.CompilerParams(
            dimension_semantics=("parallel",),
            # Headroom above v5e's 16 MiB scoped default when TN is raised;
            # TN=2048 working set (out x2 bufs, f32 temporaries, lane-padded
            # temperature bufs, resident weights) is still < 10 MiB.
            vmem_limit_bytes=32 * 1024 * 1024),
    )(t2d, scaled_freqs, freq_bias, w1_cos, w1_sin, b1r, w2c, b2r)


def _reference(T, w1, b1, w2, b2, *, t_min, t_max, freq_dim, max_period):
    """Pure-JAX f32 reference mirroring the PyTorch forward."""
    t_scale = (T - t_min) / (t_max - t_min) * 1000.0
    half = freq_dim // 2
    freqs = jnp.exp(-math.log(max_period)
                    * jnp.arange(half, dtype=jnp.float32) / half)
    args = t_scale[:, None] * freqs[None]
    emb = jnp.concatenate([jnp.cos(args), jnp.sin(args)], axis=-1)
    h = emb @ w1 + b1
    h = jax.nn.silu(h)
    return h @ w2 + b2


if __name__ == "__main__":
    # Module config: mode="sinusoidal", embed_dim=128, activation="silu",
    # params={"scaler": {"min": 0.0, "max": 500.0}, "freq_dim": 256}
    N = 32                        # small batch of temperatures
    embed_dim = 128
    freq_dim = 256
    max_period = 10000.0
    t_min, t_max = 0.0, 500.0

    key = jax.random.PRNGKey(0)
    k_t, k_w1, k_b1, k_w2, k_b2 = jax.random.split(key, 5)

    T = jax.random.uniform(k_t, (N,), jnp.float32, minval=t_min, maxval=t_max)

    # Deterministic synthetic params (stored as (in, out); x @ W + b == PyTorch Linear).
    w1 = jax.random.normal(k_w1, (freq_dim, embed_dim), jnp.float32) * (1.0 / math.sqrt(freq_dim))
    b1 = jax.random.normal(k_b1, (embed_dim,), jnp.float32) * 0.01
    w2 = jax.random.normal(k_w2, (embed_dim, embed_dim), jnp.float32) * (1.0 / math.sqrt(embed_dim))
    b2 = jax.random.normal(k_b2, (embed_dim,), jnp.float32) * 0.01

    out = temperature_embedder_sinusoidal(
        T, w1, b1, w2, b2,
        t_min=t_min, t_max=t_max, freq_dim=freq_dim, max_period=max_period)
    out = jax.block_until_ready(out)

    ref = _reference(T, w1, b1, w2, b2,
                     t_min=t_min, t_max=t_max, freq_dim=freq_dim, max_period=max_period)
    assert out.shape == (N, embed_dim)
    err = float(jnp.max(jnp.abs(out - ref)))
    # All-f32 matmuls now; residual error is f32 sin/cos range reduction at
    # ~1e3 rad plus fold-in of the scaler (fma ordering).
    assert jnp.allclose(out, ref, atol=1e-2, rtol=1e-2), err

    print("KERNEL_OK")
</pallas_src>

<mosaic_0001>
module attributes {stable_mosaic.version = 11 : i64} {
  func.func @_temp_embed_kernel(%arg0: i32, %arg1: memref<16x1xf32, #tpu.memory_space<vmem>>, %arg2: memref<1x128xf32, #tpu.memory_space<vmem>>, %arg3: memref<1x128xf32, #tpu.memory_space<vmem>>, %arg4: memref<128x128xf32, #tpu.memory_space<vmem>>, %arg5: memref<128x128xf32, #tpu.memory_space<vmem>>, %arg6: memref<1x128xf32, #tpu.memory_space<vmem>>, %arg7: memref<128x128xf32, #tpu.memory_space<vmem>>, %arg8: memref<1x128xf32, #tpu.memory_space<vmem>>, %arg9: memref<16x128xf32, #tpu.memory_space<vmem>>) attributes {dimension_semantics = [#tpu.dimension_semantics<parallel>], iteration_bounds = array<i64: 2>, scalar_prefetch = 0 : i64, scratch_operands = 0 : i64, tpu.core_type = #tpu.core_type<tc>, window_params = [{transform_indices = @transform_0, window_bounds = array<i64: 16, 1>}, {pipeline_mode = #tpu.pipeline_mode<synchronous>, transform_indices = @transform_1, window_bounds = array<i64: 1, 128>}, {pipeline_mode = #tpu.pipeline_mode<synchronous>, transform_indices = @transform_2, window_bounds = array<i64: 1, 128>}, {pipeline_mode = #tpu.pipeline_mode<synchronous>, transform_indices = @transform_3, window_bounds = array<i64: 128, 128>}, {pipeline_mode = #tpu.pipeline_mode<synchronous>, transform_indices = @transform_4, window_bounds = array<i64: 128, 128>}, {pipeline_mode = #tpu.pipeline_mode<synchronous>, transform_indices = @transform_5, window_bounds = array<i64: 1, 128>}, {pipeline_mode = #tpu.pipeline_mode<synchronous>, transform_indices = @transform_6, window_bounds = array<i64: 128, 128>}, {pipeline_mode = #tpu.pipeline_mode<synchronous>, transform_indices = @transform_7, window_bounds = array<i64: 1, 128>}, {transform_indices = @transform_8, window_bounds = array<i64: 16, 128>}]} {
    %c0 = arith.constant 0 : index
    %c0_0 = arith.constant 0 : index
    %0 = vector.load %arg1[%c0, %c0_0] : memref<16x1xf32, #tpu.memory_space<vmem>>, vector<16x1xf32>
    %c0_1 = arith.constant 0 : index
    %c0_2 = arith.constant 0 : index
    %1 = vector.load %arg2[%c0_1, %c0_2] : memref<1x128xf32, #tpu.memory_space<vmem>>, vector<1x128xf32>
    %2 = vector.broadcast %0 : vector<16x1xf32> to vector<16x128xf32>
    %3 = vector.broadcast %1 : vector<1x128xf32> to vector<16x128xf32>
    %4 = arith.mulf %2, %3 : vector<16x128xf32>
    %c0_3 = arith.constant 0 : index
    %c0_4 = arith.constant 0 : index
    %5 = vector.load %arg3[%c0_3, %c0_4] : memref<1x128xf32, #tpu.memory_space<vmem>>, vector<1x128xf32>
    %6 = vector.broadcast %5 : vector<1x128xf32> to vector<16x128xf32>
    %7 = arith.addf %4, %6 : vector<16x128xf32>
    %8 = math.cos %7 : vector<16x128xf32>
    %9 = math.sin %7 : vector<16x128xf32>
    %c0_5 = arith.constant 0 : index
    %c0_6 = arith.constant 0 : index
    %10 = vector.load %arg4[%c0_5, %c0_6] : memref<128x128xf32, #tpu.memory_space<vmem>>, vector<128x128xf32>
    %cst = arith.constant dense<0.000000e+00> : vector<16x128xf32>
    %11 = tpu.matmul %8, %10, %cst {dimension_numbers = #tpu.dot_dimension_numbers<[1], [0], [0], [1], [0, 0, 1, 1], [], []>} : vector<16x128xf32>, vector<128x128xf32>, vector<16x128xf32> -> vector<16x128xf32>
    %c0_7 = arith.constant 0 : index
    %c0_8 = arith.constant 0 : index
    %12 = vector.load %arg5[%c0_7, %c0_8] : memref<128x128xf32, #tpu.memory_space<vmem>>, vector<128x128xf32>
    %cst_9 = arith.constant dense<0.000000e+00> : vector<16x128xf32>
    %13 = tpu.matmul %9, %12, %cst_9 {dimension_numbers = #tpu.dot_dimension_numbers<[1], [0], [0], [1], [0, 0, 1, 1], [], []>} : vector<16x128xf32>, vector<128x128xf32>, vector<16x128xf32> -> vector<16x128xf32>
    %14 = arith.addf %11, %13 : vector<16x128xf32>
    %c0_10 = arith.constant 0 : index
    %c0_11 = arith.constant 0 : index
    %15 = vector.load %arg6[%c0_10, %c0_11] : memref<1x128xf32, #tpu.memory_space<vmem>>, vector<1x128xf32>
    %16 = vector.broadcast %15 : vector<1x128xf32> to vector<16x128xf32>
    %17 = arith.addf %14, %16 : vector<16x128xf32>
    %18 = arith.negf %17 : vector<16x128xf32>
    %19 = math.exp %18 : vector<16x128xf32>
    %cst_12 = arith.constant 1.000000e+00 : f32
    %20 = vector.broadcast %cst_12 : f32 to vector<16x128xf32>
    %21 = arith.addf %20, %19 : vector<16x128xf32>
    %22 = arith.divf %20, %21 : vector<16x128xf32>
    %23 = arith.mulf %17, %22 : vector<16x128xf32>
    %c0_13 = arith.constant 0 : index
    %c0_14 = arith.constant 0 : index
    %24 = vector.load %arg7[%c0_13, %c0_14] : memref<128x128xf32, #tpu.memory_space<vmem>>, vector<128x128xf32>
    %cst_15 = arith.constant dense<0.000000e+00> : vector<16x128xf32>
    %25 = tpu.matmul %23, %24, %cst_15 {dimension_numbers = #tpu.dot_dimension_numbers<[1], [0], [0], [1], [0, 0, 1, 1], [], []>} : vector<16x128xf32>, vector<128x128xf32>, vector<16x128xf32> -> vector<16x128xf32>
    %c0_16 = arith.constant 0 : index
    %c0_17 = arith.constant 0 : index
    %26 = vector.load %arg8[%c0_16, %c0_17] : memref<1x128xf32, #tpu.memory_space<vmem>>, vector<1x128xf32>
    %27 = vector.broadcast %26 : vector<1x128xf32> to vector<16x128xf32>
    %28 = arith.addf %25, %27 : vector<16x128xf32>
    %c0_18 = arith.constant 0 : index
    %c0_19 = arith.constant 0 : index
    %29 = vector.load %arg9[%c0_18, %c0_19] : memref<16x128xf32, #tpu.memory_space<vmem>>, vector<16x128xf32>
    tpu.vector_store %arg9[%c0_18, %c0_19], %28 {strides = array<i32>} : memref<16x128xf32, #tpu.memory_space<vmem>>, vector<16x128xf32>,
    return
  }
  func.func @transform_0(%arg0: i32) -> (i32, i32) {
    %c0_i32 = arith.constant 0 : i32
    %c0_i32_0 = arith.constant 0 : i32
    return %arg0, %c0_i32 : i32, i32
  }
  func.func @transform_1(%arg0: i32) -> (i32, i32) {
    %c0_i32 = arith.constant 0 : i32
    %c0_i32_0 = arith.constant 0 : i32
    %c0_i32_1 = arith.constant 0 : i32
    return %c0_i32, %c0_i32_0 : i32, i32
  }
  func.func @transform_2(%arg0: i32) -> (i32, i32) {
    %c0_i32 = arith.constant 0 : i32
    %c0_i32_0 = arith.constant 0 : i32
    %c0_i32_1 = arith.constant 0 : i32
    return %c0_i32, %c0_i32_0 : i32, i32
  }
  func.func @transform_3(%arg0: i32) -> (i32, i32) {
    %c0_i32 = arith.constant 0 : i32
    %c0_i32_0 = arith.constant 0 : i32
    %c0_i32_1 = arith.constant 0 : i32
    return %c0_i32, %c0_i32_0 : i32, i32
  }
  func.func @transform_4(%arg0: i32) -> (i32, i32) {
    %c0_i32 = arith.constant 0 : i32
    %c0_i32_0 = arith.constant 0 : i32
    %c0_i32_1 = arith.constant 0 : i32
    return %c0_i32, %c0_i32_0 : i32, i32
  }
  func.func @transform_5(%arg0: i32) -> (i32, i32) {
    %c0_i32 = arith.constant 0 : i32
    %c0_i32_0 = arith.constant 0 : i32
    %c0_i32_1 = arith.constant 0 : i32
    return %c0_i32, %c0_i32_0 : i32, i32
  }
  func.func @transform_6(%arg0: i32) -> (i32, i32) {
    %c0_i32 = arith.constant 0 : i32
    %c0_i32_0 = arith.constant 0 : i32
    %c0_i32_1 = arith.constant 0 : i32
    return %c0_i32, %c0_i32_0 : i32, i32
  }
  func.func @transform_7(%arg0: i32) -> (i32, i32) {
    %c0_i32 = arith.constant 0 : i32
    %c0_i32_0 = arith.constant 0 : i32
    %c0_i32_1 = arith.constant 0 : i32
    return %c0_i32, %c0_i32_0 : i32, i32
  }
  func.func @transform_8(%arg0: i32) -> (i32, i32) {
    %c0_i32 = arith.constant 0 : i32
    %c0_i32_0 = arith.constant 0 : i32
    return %arg0, %c0_i32 : i32, i32
  }
}

</mosaic_0001>

<bundles_post_ra>
// kernel: tpu_custom_call.1
= control target key start
LH: loop header
LB: loop body
LE: loop exit
PB: predicated region body
PF: predicated region fallthrough
CT: control target
= control target key end

     0   :  { %13 = vsyncpa [#allocation3], 0  ;;  %s2133_s0 = inlined_call_operand.vmem [shape: f32[32,1], index: 0, kind: input, shape index: {}]   ;;  %s2134_s1 = inlined_call_operand.vmem [shape: f32[1,128], index: 1, kind: input, shape index: {}]   ;;  %s2135_s2 = inlined_call_operand.vmem [shape: f32[1,128], index: 2, kind: input, shape index: {}]   ;;  %s2136_s3 = inlined_call_operand.hbm [shape: f32[128,128], index: 3, kind: input, shape index: {}]   ;;  %s2137_s4 = inlined_call_operand.hbm [shape: f32[128,128], index: 4, kind: input, shape index: {}]   ;;  %s2138_s5 = inlined_call_operand.vmem [shape: f32[1,128], index: 5, kind: input, shape index: {}]   ;;  %s2139_s6 = inlined_call_operand.hbm [shape: f32[128,128], index: 6, kind: input, shape index: {}]   ;;  %s2140_s7 = inlined_call_operand.vmem [shape: f32[1,128], index: 7, kind: input, shape index: {}]   ;;  %s2141_s8 = inlined_call_operand.hbm [shape: f32[32,128], index: 8, kind: output, shape index: {}]  }
   0x1   :  { %14 = vsyncpa [#allocation6], 0 }
   0x2   :  { %15 = vsyncpa [#allocation4], 0 }
   0x3   :  { %17 = vsyncpa [#allocation4 + $0x1], 0  ;;  %s1827_s27 = smov 0   ;;  %s1829_s28 = smov 0  }
   0x4   :  { %s1831_s29 = smov 0   ;;  %s1833_s30 = smov 0  }
   0x5 LB: > { %2149 = sst [smem:[#allocation12_spill]] %s1761_s29  ;;  %s1848_s9 = sadd.s32 4294967295, %s1765_s30   ;;  %s1765_s30 = sphi %s1833_s30, %s2166_s30   ;;  %s1761_s29 = sphi %s1831_s29, %s2168_s29   ;;  %s1757_s28 = sphi %s1829_s28, %s2170_s28   ;;  %s1753_s27 = sphi %s1827_s27, %s2169_s27  }
   0x6   : > { %s1207_s10 = sadd.s32 4294967294, %s1765_s30   ;;  %s1852_s11 = sadd.s32 1, %s1765_s30  }
   0x7   : > { %2150 = sst [smem:[#allocation13_spill]] %s1852_s11  ;;  %s203_s12 = sadd.s32 1, %s1761_s29 }
   0x8   : > { %s200_s13 = ssub.s32 %s1765_s30, %s1852_s11  ;;  %p213_p0 = scmp.ne.s32.totalorder %s1761_s29, %s1757_s28 }
   0x9   : > { %p201_p1 = scmp.eq.s32.totalorder %s200_s13, 0  ;;  %p214_p2 = scmp.eq.s32.totalorder %s1848_s9, 1 }
   0xa   : > { %p219_p3 = scmp.ne.s32.totalorder %s1757_s28, %s1753_s27  ;;  %p220_p4 = scmp.eq.s32.totalorder %s1207_s10, 1 }
   0xb   : > { %s1863_s14 = scalar_select %p201_p1, %s1761_s29, %s203_s12  }
   0xc   : > { %p1865_p5 = por %p214_p2, %p213_p0  ;;  %p1869_p6 = por %p220_p4, %p219_p3 }
   0xd   : > { %2151 = sst [smem:[#allocation14_spill]] %s1863_s14  ;;  %p1208_p7 = scmp.ge.s32.totalorder %s1765_s30, 1 }
   0xe   : > { %s2152_s15 = scalar_select %p1865_p5, 1, 0 }
   0xf   : > { %s2153_s16 = scalar_select %p1869_p6, 1, 0 }
  0x10   : > { %p227_p8 = scmp.lt.s32.totalorder %s1765_s30, 3  ;;  %p2142_p9 = scmp.eq.s32.totalorder %s1848_s9, 0 }
  0x11   : > { %2154 = sst [smem:[#allocation15_spill]] %s2153_s16  ;;  %s1767_s18 = smov [#allocation5]  }
  0x12   : > { %p1876_p10 = pnand %p1208_p7, %p227_p8  ;;  %s258_s19 = sshll.u32 %s1767_s18, 4  ;;  %s1882_s19 = int_to_ptr.vmem [resolvable:$true] %s258_s19 }
  0x13   : > { %s1768_s21 = smov [#allocation2]   ;;  %s1769_s23 = smov [#allocation7]  }
  0x14   : > { %s2155_s17 = scalar_select %p1876_p10, 1, 0 }
  0x15   : > { %p1527_p11 = pneg %p1876_p10  ;;  %s245_s22 = sshll.u32 %s1768_s21, 4  ;;  %s1890_s22 = int_to_ptr.vmem [resolvable:$true] %s245_s22 }
  0x16   : > { %s1892_s24 = sshll.u32 %s1769_s23, 4  ;;  %s1611_s10 = scalar_lea.hbm %s2137_s4, 2048  ;;  %s275_s24 = int_to_ptr.vmem [resolvable:$true] %s1892_s24 }
  0x17   : > { %p1886_p12 = pnand %p2142_p9, %p1527_p11  ;;  %p1612_p13 = scmp.ne.s32.totalorder %s2137_s4, %s1611_s10 }
  0x18   : > { %p1618_p3 = scmp.lt.u32.totalorder %s1611_s10, %s2137_s4 }
  0x19   : > { %p1902_p0 = pneg %p1886_p12 }
  0x1b   : > { %p1614_p1 = pnand %p1902_p0, %p1612_p13 }
  0x1d   : > { %p1615_p2 = pneg %p1614_p1 }
  0x1f   : > { %p1620_p4 = pnand %p1618_p3, %p1615_p2 }
  0x21   : > { %1623 = shalt.err (!%p1620_p4)
}
  0x22   : > { %s1624_s25 = scalar_lea.vmem %s1882_s19, 2048  ;;  %p1632_p9 = scmp.lt.s32.totalorder %s1882_s19, %s1882_s19 }
  0x23   : > { %p1625_p7 = scmp.ne.s32.totalorder %s1882_s19, %s1624_s25  ;;  %p1633_p6 = scmp.lt.s32.totalorder %s1624_s25, %s1624_s25 }
  0x25   : > { %p1627_p8 = pnand %p1625_p7, %p1902_p0  ;;  %p1634_p13 = por %p1633_p6, %p1632_p9 }
  0x27   : > { %p1628_p11 = pneg %p1627_p8 }
  0x29   : > { %p1635_p1 = pnand %p1634_p13, %p1628_p11 }
  0x2b   : > { %1638 = shalt.err (!%p1635_p1)
}
  0x2c   : > { %s1770_s26 = smov 128   ;;  %s1771_s10 = smov 8  }
  0x2d   : > { %1533 = dma.hbm_to_vmem [thread:$0]  (!%p1886_p12), %s2137_s4, 2048, %s1882_s19, [#allocation6], %s1770_s26, %s1770_s26, %s1771_s10  }
  0x2e   : > { %s1639_s25 = scalar_lea.hbm %s2136_s3, 2048 }
  0x2f   : > { %p1640_p6 = scmp.ne.s32.totalorder %s2136_s3, %s1639_s25  ;;  %p1646_p3 = scmp.lt.u32.totalorder %s1639_s25, %s2136_s3 }
  0x31   : > { %p1642_p9 = pnand %p1640_p6, %p1902_p0 }
  0x33   : > { %p1643_p2 = pneg %p1642_p9 }
  0x35   : > { %p1648_p4 = pnand %p1646_p3, %p1643_p2 }
  0x37   : > { %1651 = shalt.err (!%p1648_p4)
}
  0x38   : > { %s1652_s19 = scalar_lea.vmem %s1890_s22, 2048  ;;  %p1660_p13 = scmp.lt.s32.totalorder %s1890_s22, %s1890_s22 }
  0x39   : > { %p1653_p7 = scmp.ne.s32.totalorder %s1890_s22, %s1652_s19  ;;  %p1661_p1 = scmp.lt.s32.totalorder %s1652_s19, %s1652_s19 }
  0x3b   : > { %p1655_p8 = pnand %p1653_p7, %p1902_p0  ;;  %p1662_p6 = por %p1661_p1, %p1660_p13 }
  0x3d   : > { %p1656_p11 = pneg %p1655_p8 }
  0x3f   : > { %p1663_p9 = pnand %p1662_p6, %p1656_p11 }
  0x41   : > { %1666 = shalt.err (!%p1663_p9)
}
  0x42   : > { %1530 = dma.hbm_to_vmem [thread:$0]  (!%p1886_p12), %s2136_s3, 2048, %s1890_s22, [#allocation3], %s1770_s26, %s1770_s26, %s1771_s10  }
  0x43   : > { %s1667_s12 = scalar_lea.hbm %s2139_s6, 2048 }
  0x44   : > { %p1668_p2 = scmp.ne.s32.totalorder %s2139_s6, %s1667_s12  ;;  %p1674_p7 = scmp.lt.u32.totalorder %s1667_s12, %s2139_s6 }
  0x46   : > { %p1670_p3 = pnand %p1668_p2, %p1902_p0 }
  0x48   : > { %p1671_p4 = pneg %p1670_p3 }
  0x4a   : > { %p1676_p8 = pnand %p1674_p7, %p1671_p4 }
  0x4c   : > { %1679 = shalt.err (!%p1676_p8)
}
  0x4d   : > { %s1680_s19 = scalar_lea.vmem %s275_s24, 2048  ;;  %p1688_p6 = scmp.lt.s32.totalorder %s275_s24, %s275_s24 }
  0x4e   : > { %p1681_p11 = scmp.ne.s32.totalorder %s275_s24, %s1680_s19  ;;  %p1689_p9 = scmp.lt.s32.totalorder %s1680_s19, %s1680_s19 }
  0x50   : > { %p1683_p13 = pnand %p1681_p11, %p1902_p0  ;;  %p1690_p5 = por %p1689_p9, %p1688_p6 }
  0x52   : > { %p1684_p1 = pneg %p1683_p13 }
  0x54   : > { %p1691_p10 = pnand %p1690_p5, %p1684_p1 }
  0x56   : > { %1694 = shalt.err (!%p1691_p10)
}
  0x57   : > { %1536 = dma.hbm_to_vmem [thread:$0]  (!%p1886_p12), %s2139_s6, 2048, %s275_s24, [#allocation6], %s1770_s26, %s1770_s26, %s1771_s10  }
  0x58   : > { %p2158_p2 = scmp.ne.s32.totalorder %s2155_s17, 0 }
  0x59   : > { %p2159_p0 = scmp.eq.s32.totalorder (!%p2158_p2), %s1848_s9, 0 }
  0x5a   : > { %302 = sbr.rel (%p2158_p2) target bundleno = 836 (0x344), region = 52 }
  0x61   : > { %1740 = dma.done.wait (%p2159_p0), [#allocation3], 2048   ;;  %p2160_p3 = pmov %p2159_p0 }
  0x62   : > { %p2161_p5 = pmov %p2159_p0 }
  0x63   : > { %1742 = vsyncadd (%p2160_p3), [#allocation3], 4294965248 }
  0x64   : > { %1744 = dma.done.wait (%p2161_p5), [#allocation6], 4096   ;;  %p2162_p10 = pmov %p2159_p0 }
  0x65   : > { %s1218_s20 = sshll.u32 %s1848_s9, 1  ;;  %v1772_v0 = vmov 0   ;;  %v811_v3 = vld [vmem:[#allocation5] sm:$0xff]  ;;  %v812_v4 = vld [vmem:[#allocation5 + $0x8] sm:$0xff]  ;;  %v813_v5 = vld [vmem:[#allocation5 + $0x10] sm:$0xff]  ;;  %s341_s21 = sand.u32 1, %s1757_s28  }
  0x66   : > { %1746 = vsyncadd (%p2162_p10), [#allocation6], 4294963200  ;;  %1594 = vset.pattern.permute.xlu0 %v1772_v0  ;;  %p345_p12 = scmp.lt.s32.totalorder %s1218_s20, 3  ;;  %v1407_v6 = vpack.c.bf16 %v812_v4, %v811_v3  ;;  %v814_v7 = vld [vmem:[#allocation5 + $0x18] sm:$0xff]  ;;  %v815_v9 = vld [vmem:[#allocation5 + $0x20] sm:$0xff]  ;;  %s1217_s23 = sshll.u32 %s341_s21, 4 }
  0x67   : > { %v1411_v8 = vpack.c.bf16 %v814_v7, %v813_v5  ;;  %v816_v10 = vld [vmem:[#allocation5 + $0x28] sm:$0xff]  ;;  %v817_v12 = vld [vmem:[#allocation5 + $0x30] sm:$0xff]  ;;  %v818_v13 = vld [vmem:[#allocation5 + $0x38] sm:$0xff]  ;;  %v1773_v56 = vmov 683565275   ;;  %s343_s22 = scalar_lea.vmem [#allocation8], %s1217_s23 }
  0x68   : > { %s2172_s20 = smov (!%p345_p12, %s1218_s20), 3  ;;  %1408 = vmatprep.subr.bf16.mxu0 %v1407_v6  ;;  %v1415_v11 = vpack.c.bf16 %v816_v10, %v815_v9  ;;  %v1419_v14 = vpack.c.bf16 %v818_v13, %v817_v12  ;;  %v819_v15 = vld [vmem:[#allocation5 + $0x40] sm:$0xff]  ;;  %v820_v16 = vld [vmem:[#allocation5 + $0x48] sm:$0xff]  ;;  %v821_v18 = vld [vmem:[#allocation5 + $0x50] sm:$0xff]  ;;  %v1774_v59 = vmov 2475754826  }
  0x69   : > { %s1219_s17 = sshll.u32 %s2172_s20, 3  ;;  %1410 = vmatpush3.bf16.msra.mxu0 %v1407_v6  ;;  %v1423_v17 = vpack.c.bf16 %v820_v16, %v819_v15  ;;  %v822_v19 = vld [vmem:[#allocation5 + $0x58] sm:$0xff]  ;;  %v823_v21 = vld [vmem:[#allocation5 + $0x60] sm:$0xff]  ;;  %v824_v22 = vld [vmem:[#allocation5 + $0x68] sm:$0xff]  ;;  %v1775_v61 = vmov 2131351028  }
  0x6a   : > { %s348_s26 = scalar_lea.vmem %s2133_s0, %s1219_s17  ;;  %1412 = vmatprep.subr.bf16.mxu0 %v1411_v8  ;;  %v1427_v20 = vpack.c.bf16 %v822_v19, %v821_v18  ;;  %v1431_v23 = vpack.c.bf16 %v824_v22, %v823_v21  ;;  %v825_v24 = vld [vmem:[#allocation5 + $0x70] sm:$0xff]  ;;  %v826_v25 = vld [vmem:[#allocation5 + $0x78] sm:$0xff]  ;;  %v795_v27 = vld [vmem:[#allocation2] sm:$0xff]  ;;  %v1776_v63 = vmov 2102212464   ;;  %s1114_s29 = sshll.u32 %s343_s22, 4  ;;  %s2085_s29 = int_to_ptr.vmem [resolvable:$true] %s1114_s29 }
  0x6b   : > { %v351_v1 = vld [vmem:[%s348_s26] sm:$0xff]  ;;  %v352_v2 = vld [vmem:[%s348_s26 + $0x8] sm:$0xff]  ;;  %v1435_v26 = vpack.c.bf16 %v826_v25, %v825_v24  ;;  %v1777_v4 = vmov 920167782   ;;  %v1778_v9 = vmov 1326507024  }
  0x6c   : > { %356 = vperm.xlu0 %1594, %v351_v1   ;;  %v796_v28 = vld [vmem:[#allocation2 + $0x8] sm:$0xff]  ;;  %v1220_v30 = vld [vmem:[%s2134_s1] ss:$0 sm:$0xff]  ;;  %s1247_s20 = sshll.u32 %s1848_s9, 8  ;;  %s2092_s26 = scalar_lea.sflag [#allocation4], %s341_s21 }
  0x6d   : > { %1414 = vmatpush3.bf16.msra.mxu0 %v1411_v8  ;;  %v1988_v29 = vpack.c.bf16 %v796_v28, %v795_v27  ;;  %v1221_v31 = vld [vmem:[%s2135_s2] ss:$0 sm:$0xff]  ;;  %s2090_s18 = scalar_lea.hbm %s2141_s8, %s1247_s20  ;;  %s1695_s10 = scalar_lea.vmem %s2085_s29, 256 }
  0x6e   : > { %1416 = vmatprep.subr.bf16.mxu0 %v1415_v11  ;;  %p1696_p4 = scmp.ne.s32.totalorder %s2085_s29, %s1695_s10  ;;  %p2163_p7 = scmp.ne.s32.totalorder %s2152_s15, 0 }
  0x6f   : > { %s1779_s9 = smov [#allocation8]  }
  0x70   : > { %361 = vperm.xlu0 %1594, %v352_v2   ;;  %p1697_p8 = pnand %p1696_p4, %p2163_p7  ;;  %s1699_s11 = sshll.u32 %s1779_s9, 4  ;;  %s1700_s11 = int_to_ptr.vmem [resolvable:$false] %s1699_s11 }
  0x71   : > { %1418 = vmatpush3.bf16.msra.mxu0 %v1415_v11  ;;  %s1701_s14 = scalar_lea.vmem %s1700_s11, 512  ;;  %p1702_p13 = scmp.lt.s32.totalorder %s2085_s29, %s1700_s11 }
  0x72   : > { %1420 = vmatprep.subr.bf16.mxu0 %v1419_v14  ;;  %p1698_p11 = pneg %p1697_p8  ;;  %p1703_p1 = scmp.lt.s32.totalorder %s1701_s14, %s1695_s10 }
  0x74   : > { %p1704_p6 = por %p1703_p1, %p1702_p13 }
  0x75   : > { %1422 = vmatpush3.bf16.msra.mxu0 %v1419_v14 }
  0x76   : > { %1424 = vmatprep.subr.bf16.mxu0 %v1423_v17  ;;  %p1705_p9 = pnand %p1704_p6, %p1698_p11 }
  0x79   : > { %1426 = vmatpush3.bf16.msra.mxu0 %v1423_v17 }
  0x7a   : > { %1428 = vmatprep.subr.bf16.mxu0 %v1427_v20 }
  0x7d   : > { %1430 = vmatpush3.bf16.msra.mxu0 %v1427_v20 }
  0x7e   : > { %1432 = vmatprep.subr.bf16.mxu0 %v1431_v23 }
  0x81   : > { %1434 = vmatpush3.bf16.msra.mxu0 %v1431_v23 }
  0x82   : > { %1436 = vmatprep.subr.bf16.mxu0 %v1435_v26 }
  0x85   : > { %1438 = vmatpush3.bf16.msra.mxu0 %v1435_v26 }
  0x86   : > { %1440 = vmatprep.subr.bf16.mxu0 %v1988_v29 }
  0xeb   : > { %v357_v32 = vpop.permute.xlu0 %356 }
  0xec   : > { %v370_v33 = vmul.f32 %v1220_v30, %v357_v32 }
  0xee   : > { %v1997_v34 = vadd.f32 %v1221_v31, %v370_v33 }
  0xef   : > { %v362_v35 = vpop.permute.xlu0 %361 }
  0xf0   : > { %v384_v36 = vand.u32 2139095040, %v1997_v34  ;;  %v371_v37 = vmul.f32 %v1220_v30, %v362_v35  ;;  %v381_v40 = vand.u32 2147483647, %v1997_v34  ;;  %vm383_vm14 = vcmp.lt.s32.totalorder %v1997_v34, 0 }
  0xf2   : > { %v385_v38 = vshrl.u32 %v384_v36, 23  ;;  %v2000_v39 = vadd.f32 %v1221_v31, %v371_v37  ;;  %v388_v46 = vand.u32 8388607, %v381_v40  ;;  %vm382_vm15 = vcmp.le.f32.partialorder %v381_v40, 0.7853982 }
  0xf4   : > { %v1222_v41 = vadd.s32 4294967169, %v385_v38  ;;  %v487_v42 = vand.u32 2139095040, %v2000_v39  ;;  %v484_v43 = vand.u32 2147483647, %v2000_v39  ;;  %v389_v52 = vor.u32 8388608, %v388_v46 }
  0xf6   : > { %v391_v44 = vadd.s32 1, %v1222_v41  ;;  %v488_v45 = vshrl.u32 %v487_v42, 23  ;;  %v491_v47 = vand.u32 8388607, %v484_v43  ;;  %v429_v23 = vshll.u32 %v389_v52, 8 }
  0xf8   : > { %vm392_vm0 = vcmp.gt.s32.totalorder %v391_v44, 0  ;;  %v1226_v48 = vadd.s32 4294967169, %v488_v45  ;;  %v492_v53 = vor.u32 8388608, %v491_v47 }
  0xf9   : > { %v393_v49 = vsel %vm392_vm0, %v391_v44, 0  ;;  %vm486_vm0 = vcmp.lt.s32.totalorder %v2000_v39, 0 }
  0xfa   : > { %v395_v50 = vand.u32 31, %v393_v49  ;;  %v494_v51 = vadd.s32 1, %v1226_v48  ;;  %v394_v54 = vshrl.u32 %v393_v49, 5  ;;  %v532_v35 = vshll.u32 %v492_v53, 8 }
  0xfc   : > { %v396_v55 = vsub.s32 32, %v395_v50  ;;  %vm495_vm1 = vcmp.gt.s32.totalorder %v494_v51, 0  ;;  %v398_v57 = vshll.u32 %v1773_v56, %v395_v50  ;;  %v401_v60 = vshll.u32 %v1774_v59, %v395_v50 }
  0xfd   : > { %v496_v58 = vsel %vm495_vm1, %v494_v51, 0  ;;  %v404_v62 = vshll.u32 %v1775_v61, %v395_v50  ;;  %v407_v0 = vshll.u32 %v1776_v63, %v395_v50  ;;  %v410_v5 = vshll.u32 %v1777_v4, %v395_v50 }
  0xfe   : > { %v2010_v1 = vshrl.u32 %v496_v58, 5  ;;  %v498_v2 = vand.u32 31, %v496_v58  ;;  %v399_v3 = vshrl.u32 %v1774_v59, %v396_v55  ;;  %v402_v6 = vshrl.u32 %v1775_v61, %v396_v55 }
  0xff   : > { %v405_v7 = vshrl.u32 %v1776_v63, %v396_v55  ;;  %v408_v8 = vshrl.u32 %v1777_v4, %v396_v55  ;;  %v411_v10 = vshrl.u32 %v1778_v9, %v396_v55  ;;  %v397_v14 = vshrl.u32 %v1773_v56, %v396_v55 }
 0x100   : > { %v499_v11 = vsub.s32 32, %v498_v2  ;;  %v510_v12 = vshll.u32 %v1776_v63, %v498_v2  ;;  %v513_v13 = vshll.u32 %v1777_v4, %v498_v2  ;;  %v400_v15 = vor.u32 %v399_v3, %v398_v57 }
 0x101   : > { %v403_v16 = vor.u32 %v402_v6, %v401_v60  ;;  %v406_v17 = vor.u32 %v405_v7, %v404_v62  ;;  %v409_v18 = vor.u32 %v408_v8, %v407_v0  ;;  %v412_v21 = vor.u32 %v411_v10, %v410_v5 }
 0x102   : > { %v511_v19 = vshrl.u32 %v1777_v4, %v499_v11  ;;  %v514_v20 = vshrl.u32 %v1778_v9, %v499_v11  ;;  %vm413_vm2 = vcmp.lt.s32.totalorder %v394_v54, 1  ;;  %vm415_vm3 = vcmp.lt.s32.totalorder %v394_v54, 3 }
 0x103   : > { %vm416_vm4 = vcmp.lt.s32.totalorder %v394_v54, 4  ;;  %v417_v22 = vsel %vm413_vm2, %v397_v14, %v400_v15  ;;  %v421_v27 = vsel %vm413_vm2, %v400_v15, %v403_v16  ;;  %v425_v31 = vsel %vm413_vm2, %v403_v16, %v406_v17 }
 0x104   : > { %v512_v24 = vor.u32 %v511_v19, %v510_v12  ;;  %v515_v25 = vor.u32 %v514_v20, %v513_v13  ;;  %v418_v26 = vsel %vm416_vm4, %v406_v17, 2102212464  ;;  %v422_v30 = vsel %vm416_vm4, %v409_v18, 920167782 }
 0x105   : > { %v419_v28 = vsel %vm415_vm3, %v403_v16, %v418_v26  ;;  %v426_v32 = vsel %vm416_vm4, %v412_v21, 1326507024  ;;  %vm519_vm5 = vcmp.lt.s32.totalorder %v2010_v1, 4  ;;  %vm414_vm6 = vcmp.lt.s32.totalorder %v394_v54, 2 }
 0x106   : > { %v423_v33 = vsel %vm415_vm3, %v406_v17, %v422_v30  ;;  %v525_v36 = vsel %vm519_vm5, %v512_v24, 920167782  ;;  %v529_v37 = vsel %vm519_vm5, %v515_v25, 1326507024  ;;  %v427_v41 = vsel %vm415_vm3, %v409_v18, %v426_v32 }
 0x107   : > { %v424_v38 = vsel %vm414_vm6, %v421_v27, %v423_v33  ;;  %v420_v42 = vsel %vm414_vm6, %v417_v22, %v419_v28  ;;  %v428_v44 = vsel %vm414_vm6, %v425_v31, %v427_v41  ;;  %v501_v49 = vshll.u32 %v1773_v56, %v498_v2 }
 0x108   : > { %v2021_v45 = vmul.u32.u64.low %v429_v23, %v424_v38  ;;  %v2022_v46 = vmul.u32.u64.high %v429_v23, %v424_v38, %v2021_v45  ;;  %v2024_v47 = vmul.u32.u64.low %v429_v23, %v428_v44  ;;  %v2025_v48 = vmul.u32.u64.high %v429_v23, %v428_v44, %v2024_v47 }
 0x109   : > { %v502_v50 = vshrl.u32 %v1774_v59, %v499_v11  ;;  %v504_v51 = vshll.u32 %v1774_v59, %v498_v2  ;;  %v505_v52 = vshrl.u32 %v1775_v61, %v499_v11  ;;  %v507_v53 = vshll.u32 %v1775_v61, %v498_v2 }
 0x10a   : > { %v508_v55 = vshrl.u32 %v1776_v63, %v499_v11  ;;  %v436_v57 = vmul.u32 %v429_v23, %v420_v42  ;;  %v500_v58 = vshrl.u32 %v1773_v56, %v499_v11  ;;  %vm516_vm7 = vcmp.lt.s32.totalorder %v2010_v1, 1 }
 0x10b   : > { %v503_v54 = vor.u32 %v502_v50, %v501_v49  ;;  %v439_v60 = vadd.s32 1, %v2022_v46  ;;  %v506_v62 = vor.u32 %v505_v52, %v504_v51  ;;  %vm518_vm8 = vcmp.lt.s32.totalorder %v2010_v1, 3 }
 0x10c   : > { %v509_v0 = vor.u32 %v508_v55, %v507_v53  ;;  %vm438_vm9 = vc.u32 %v2025_v48, %v2021_v45  ;;  %vm517_vm10 = vcmp.lt.s32.totalorder %v2010_v1, 2  ;;  %v530_v61 = vsel %vm518_vm8, %v512_v24, %v529_v37 }
 0x10d   : > { %v520_v59 = vsel %vm516_vm7, %v500_v58, %v503_v54  ;;  %v440_v63 = vsel %vm438_vm9, %v439_v60, %v2022_v46  ;;  %v524_v2 = vsel %vm516_vm7, %v503_v54, %v506_v62  ;;  %v437_v32 = vadd.s32 %v2021_v45, %v2025_v48 }
 0x10e   : > { %v521_v56 = vsel %vm519_vm5, %v509_v0, 2102212464  ;;  %v526_v3 = vsel %vm518_vm8, %v509_v0, %v525_v36  ;;  %v441_v4 = vadd.s32 %v440_v63, %v436_v57  ;;  %v528_v7 = vsel %vm516_vm7, %v506_v62, %v509_v0 }
 0x10f   : > { %v522_v5 = vsel %vm518_vm8, %v506_v62, %v521_v56  ;;  %v527_v6 = vsel %vm517_vm10, %v524_v2, %v526_v3  ;;  %v531_v8 = vsel %vm517_vm10, %v528_v7, %v530_v61  ;;  %vm485_vm1 = vcmp.le.f32.partialorder %v484_v43, 0.7853982 }
 0x110   : > { %v2043_v9 = vmul.u32.u64.low %v532_v35, %v527_v6  ;;  %v2044_v10 = vmul.u32.u64.high %v532_v35, %v527_v6, %v2043_v9  ;;  %v442_v11 = vadd.s32 536870912, %v441_v4  ;;  %v523_v14 = vsel %vm517_vm10, %v520_v59, %v522_v5 }
 0x111   : > { %v2046_v12 = vmul.u32.u64.low %v532_v35, %v531_v8  ;;  %v2047_v13 = vmul.u32.u64.high %v532_v35, %v531_v8, %v2046_v12  ;;  %v539_v18 = vmul.u32 %v532_v35, %v523_v14  ;;  %vm473_vm5 = vweird.f32 %v1997_v34 }
 0x112   : > { %v443_v15 = vshrl.u32 %v442_v11, 30  ;;  %v542_v16 = vadd.s32 1, %v2044_v10 }
 0x113   : > { %vm541_vm11 = vc.u32 %v2047_v13, %v2043_v9  ;;  %v540_v53 = vadd.s32 %v2043_v9, %v2047_v13 }
 0x114   : > { %v444_v17 = vshll.u32 %v443_v15, 30  ;;  %v543_v19 = vsel %vm541_vm11, %v542_v16, %v2044_v10  ;;  %v467_v48 = vsub.s32 4, %v443_v15 }
 0x115   : > { %v544_v20 = vadd.s32 %v543_v19, %v539_v18 }
 0x116   : > { %v445_v1 = vsub.s32 %v441_v4, %v444_v17  ;;  %v468_v63 = vsel %vm383_vm14, %v467_v48, %v443_v15 }
 0x117   : > { %v545_v22 = vadd.s32 536870912, %v544_v20  ;;  %v470_v3 = vsel %vm382_vm15, 0, %v468_v63 }
 0x118   : > { %v447_v21 = vsub.s32 0, %v445_v1  ;;  %v680_v8 = vadd.s32 3, %v470_v3 }
 0x119   : > { %v546_v24 = vshrl.u32 %v545_v22, 30 }
 0x11a   : > { %v1223_v23 = vmin.u32 %v447_v21, %v445_v1  ;;  %v681_v11 = vand.u32 3, %v680_v8  ;;  %v1005_v8 = vld [vmem:[#allocation7 + $0x28] sm:$0xff] }
 0x11b   : > { %v547_v26 = vshll.u32 %v546_v24, 30  ;;  %v570_v7 = vsub.s32 4, %v546_v24 }
 0x11c   : > { %v449_v25 = vclz %v1223_v23  ;;  %vm686_vm2 = vcmp.eq.s32.totalorder %v681_v11, 2  ;;  %vm683_vm3 = vcmp.eq.s32.totalorder %v681_v11, 0  ;;  %vm682_vm4 = vcmp.lt.s32.totalorder %v681_v11, 2  ;;  %v1008_v11 = vld [vmem:[#allocation7 + $0x40] sm:$0xff] }
 0x11d   : > { %v548_v28 = vsub.s32 %v544_v20, %v547_v26  ;;  %v571_v10 = vsel %vm486_vm0, %v570_v7, %v546_v24  ;;  %v474_v20 = vand.u32 3, %v470_v3  ;;  %v1004_v7 = vld [vmem:[#allocation7 + $0x20] sm:$0xff] }
 0x11e   : > { %v1224_v27 = vadd.s32 4294967294, %v449_v25  ;;  %v2062_v14 = vsel %vm485_vm1, 0, %v571_v10  ;;  %v1007_v10 = vld [vmem:[#allocation7 + $0x38] sm:$0xff] }
 0x11f   : > { %v550_v31 = vsub.s32 0, %v548_v28  ;;  %v784_v19 = vadd.s32 3, %v2062_v14  ;;  %vm476_vm6 = vcmp.eq.s32.totalorder %v474_v20, 0  ;;  %vm479_vm7 = vcmp.eq.s32.totalorder %v474_v20, 2 }
 0x120   : > { %vm1225_vm12 = vcmp.lt.s32.totalorder %v1224_v27, 0  ;;  %vm475_vm10 = vcmp.lt.s32.totalorder %v474_v20, 2 }
 0x121   : > { %v452_v30 = vsel %vm1225_vm12, 0, %v1224_v27  ;;  %v1227_v36 = vmin.u32 %v550_v31, %v548_v28  ;;  %v785_v22 = vand.u32 3, %v784_v19  ;;  %v798_v31 = vld [vmem:[#allocation2 + $0x18] sm:$0xff]  ;;  %vm576_vm12 = vweird.f32 %v2000_v39 }
 0x122   : > { %v453_v33 = vsub.s32 32, %v452_v30  ;;  %v457_v35 = vsub.s32 4294967266, %v452_v30  ;;  %v454_v37 = vshll.u32 %v445_v1, %v452_v30  ;;  %v797_v30 = vld [vmem:[#allocation2 + $0x10] sm:$0xff] }
 0x123   : > { %v552_v42 = vclz %v1227_v36  ;;  %vm790_vm8 = vcmp.eq.s32.totalorder %v785_v22, 2  ;;  %vm787_vm9 = vcmp.eq.s32.totalorder %v785_v22, 0  ;;  %vm786_vm11 = vcmp.lt.s32.totalorder %v785_v22, 2 }
 0x124   : > { %v455_v38 = vshrl.u32 %v437_v32, %v453_v33  ;;  %v458_v41 = vadd.s32 127, %v457_v35 }
 0x125   : > { %v1228_v47 = vadd.s32 4294967294, %v552_v42  ;;  %v800_v42 = vld [vmem:[#allocation2 + $0x28] sm:$0xff] }
 0x126   : > { %v456_v44 = vor.u32 %v455_v38, %v454_v37  ;;  %v459_v46 = vshll.u32 %v458_v41, 23  ;;  %v1443_v37 = vpack.c.bf16 %v798_v31, %v797_v30  ;;  %v799_v41 = vld [vmem:[#allocation2 + $0x20] sm:$0xff] }
 0x127   : > { %vm1229_vm13 = vcmp.lt.s32.totalorder %v1228_v47, 0 }
 0x128   : > { %v460_v49 = vor.u32 4788187, %v459_v46  ;;  %v463_v51 = vcvt.s32.f32 %v456_v44  ;;  %v555_v52 = vsel %vm1229_vm13, 0, %v1228_v47  ;;  %v1447_v46 = vpack.c.bf16 %v800_v42, %v799_v41  ;;  %v801_v47 = vld [vmem:[#allocation2 + $0x30] sm:$0xff] }
 0x129   : > { %v556_v55 = vsub.s32 32, %v555_v52  ;;  %v560_v57 = vsub.s32 4294967266, %v555_v52  ;;  %v557_v58 = vshll.u32 %v548_v28, %v555_v52  ;;  %v804_v52 = vld [vmem:[#allocation2 + $0x48] sm:$0xff] }
 0x12a   : > { %v461_v50 = vand.u32 2147483647, %v460_v49  ;;  %v802_v49 = vld [vmem:[#allocation2 + $0x38] sm:$0xff] }
 0x12b   : > { %v558_v54 = vshrl.u32 %v540_v53, %v556_v55  ;;  %v561_v60 = vadd.s32 127, %v560_v57  ;;  %v805_v55 = vld [vmem:[#allocation2 + $0x50] sm:$0xff]  ;;  %v806_v57 = vld [vmem:[#allocation2 + $0x58] sm:$0xff] }
 0x12c   : > { %v464_v45 = vmul.f32 %v463_v51, %v461_v50  ;;  %v1451_v50 = vpack.c.bf16 %v802_v49, %v801_v47  ;;  %v803_v51 = vld [vmem:[#allocation2 + $0x40] sm:$0xff] }
 0x12d   : > { %v559_v0 = vor.u32 %v558_v54, %v557_v58  ;;  %v562_v59 = vshll.u32 %v561_v60, 23  ;;  %v1455_v53 = vpack.c.bf16 %v804_v52, %v803_v51  ;;  %v809_v58 = vld [vmem:[#allocation2 + $0x70] sm:$0xff]  ;;  %v810_v54 = vld [vmem:[#allocation2 + $0x78] sm:$0xff]  ;;  %v577_v60 = vand.u32 3, %v2062_v14 }
 0x12e   : > { %v465_v62 = vxor.u32 2147483648, %v464_v45  ;;  %v1010_v14 = vld [vmem:[#allocation7 + $0x50] sm:$0xff] }
 0x12f   : > { %v563_v2 = vor.u32 4788187, %v562_v59  ;;  %v566_v5 = vcvt.s32.f32 %v559_v0  ;;  %vm579_vm13 = vcmp.eq.s32.totalorder %v577_v60, 0 }
 0x130   : > { %v466_v61 = vsel %vm383_vm14, %v465_v62, %v464_v45  ;;  %v807_v45 = vld [vmem:[#allocation2 + $0x60] sm:$0xff]  ;;  %v1467_v62 = vpack.c.bf16 %v810_v54, %v809_v58  ;;  %vm582_vm14 = vcmp.eq.s32.totalorder %v577_v60, 2 }
 0x131   : > { %v469_v56 = vsel %vm382_vm15, %v1997_v34, %v466_v61  ;;  %v564_v4 = vand.u32 2147483647, %v563_v2  ;;  %v1459_v34 = vpack.c.bf16 %v806_v57, %v805_v55  ;;  %vm578_vm15 = vcmp.lt.s32.totalorder %v577_v60, 2  ;;  %v1001_v2 = vld [vmem:[#allocation7 + $0x8] sm:$0xff] }
 0x132   : > { %1595 = vcosq.f32 %v469_v56 }
 0x133   : > { %1597 = vsinq.f32 %v469_v56  ;;  %v567_v6 = vmul.f32 %v566_v5, %v564_v4  ;;  %v1000_v56 = vld [vmem:[#allocation7] sm:$0xff]  ;;  %v1002_v4 = vld [vmem:[#allocation7 + $0x10] sm:$0xff]  ;;  %v1003_v5 = vld [vmem:[#allocation7 + $0x18] sm:$0xff] }
 0x134   : > { %v1471_v3 = vpack.c.bf16 %v1001_v2, %v1000_v56 }
 0x135   : > { %v568_v9 = vxor.u32 2147483648, %v567_v6 }
 0x136   : > { %1472 = vmatprep.subr.bf16.mxu1 %v1471_v3 }
 0x137   : > { %v569_v40 = vsel %vm486_vm0, %v568_v9, %v567_v6  ;;  %1474 = vmatpush3.bf16.msra.mxu1 %v1471_v3  ;;  %v1475_v6 = vpack.c.bf16 %v1003_v5, %v1002_v4  ;;  %v1479_v9 = vpack.c.bf16 %v1005_v8, %v1004_v7 }
 0x138   : > { %v572_v12 = vsel %vm485_vm1, %v2000_v39, %v569_v40  ;;  %v1006_v40 = vld [vmem:[#allocation7 + $0x30] sm:$0xff] }
 0x139   : > { %1599 = vcosq.f32 %v572_v12  ;;  %1476 = vmatprep.subr.bf16.mxu1 %v1475_v6  ;;  %v1483_v39 = vpack.c.bf16 %v1007_v10, %v1006_v40 }
 0x13a   : > { %1601 = vsinq.f32 %v572_v12  ;;  %v1009_v12 = vld [vmem:[#allocation7 + $0x48] sm:$0xff] }
 0x13b   : > { %1478 = vmatpush3.bf16.msra.mxu1 %v1475_v6 }
 0x13c   : > { %v1596_v13 = vpop.eup %1595  ;;  %1480 = vmatprep.subr.bf16.mxu1 %v1479_v9 }
 0x13d   : > { %v1598_v15 = vpop.eup %1597  ;;  %v480_v16 = vxor.u32 2147483648, %v1596_v13 }
 0x13e   : > { %v477_v17 = vxor.u32 2147483648, %v1598_v15 }
 0x13f   : > { %v688_v18 = vsel %vm686_vm2, %v480_v16, %v1598_v15  ;;  %v481_v27 = vsel %vm479_vm7, %v480_v16, %v1598_v15  ;;  %1482 = vmatpush3.bf16.msra.mxu1 %v1479_v9  ;;  %v1011_v15 = vld [vmem:[#allocation7 + $0x58] sm:$0xff] }
 0x140   : > { %v685_v43 = vsel %vm683_vm3, %v1596_v13, %v477_v17  ;;  %v478_v26 = vsel %vm476_vm6, %v1596_v13, %v477_v17  ;;  %1484 = vmatprep.subr.bf16.mxu1 %v1483_v39  ;;  %v1487_v13 = vpack.c.bf16 %v1009_v12, %v1008_v11  ;;  %v1491_v16 = vpack.c.bf16 %v1011_v15, %v1010_v14  ;;  %v1012_v17 = vld [vmem:[#allocation7 + $0x60] sm:$0xff] }
 0x141   : > { %v689_v1 = vsel %vm682_vm4, %v685_v43, %v688_v18  ;;  %v482_v35 = vsel %vm475_vm10, %v478_v26, %v481_v27  ;;  %v1013_v18 = vld [vmem:[#allocation7 + $0x68] sm:$0xff]  ;;  %v1014_v43 = vld [vmem:[#allocation7 + $0x70] sm:$0xff] }
 0x142   : > { %v690_v21 = vsel %vm473_vm5, nan, %v689_v1  ;;  %v483_v44 = vsel %vm473_vm5, nan, %v482_v35  ;;  %v1495_v19 = vpack.c.bf16 %v1013_v18, %v1012_v17  ;;  %v1015_v1 = vld [vmem:[#allocation7 + $0x78] sm:$0xff] }
 0x143   : > { %1334 = vmatprep.mubr.f32.mxu0 %v690_v21  ;;  %v1600_v23 = vpop.eup %1599  ;;  %1486 = vmatpush3.bf16.msra.mxu1 %v1483_v39  ;;  %v1499_v20 = vpack.c.bf16 %v1015_v1, %v1014_v43  ;;  %v1238_v21 = vld [vmem:[%s2138_s5] ss:$0 sm:$0xff] }
 0x144   : > { %v1602_v24 = vpop.eup %1601  ;;  %v583_v25 = vxor.u32 2147483648, %v1600_v23  ;;  %1488 = vmatprep.subr.bf16.mxu1 %v1487_v13 }
 0x145   : > { %v580_v28 = vxor.u32 2147483648, %v1602_v24 }
 0x146   : > { %v792_v32 = vsel %vm790_vm8, %v583_v25, %v1602_v24  ;;  %v584_v59 = vsel %vm582_vm14, %v583_v25, %v1602_v24 }
 0x147   : > { %v789_v33 = vsel %vm787_vm9, %v1600_v23, %v580_v28  ;;  %v581_v0 = vsel %vm579_vm13, %v1600_v23, %v580_v28  ;;  %1490 = vmatpush3.bf16.msra.mxu1 %v1487_v13 }
 0x148   : > { %v793_v36 = vsel %vm786_vm11, %v789_v33, %v792_v32  ;;  %v585_v61 = vsel %vm578_vm15, %v581_v0, %v584_v59  ;;  %1492 = vmatprep.subr.bf16.mxu1 %v1491_v16 }
 0x149   : > { %v794_v38 = vsel %vm576_vm12, nan, %v793_v36  ;;  %v586_v63 = vsel %vm576_vm12, nan, %v585_v61 }
 0x14a   : > { %1335 = vmatmul.mubr.f32.vlgmr.msra.gmra.mrb[0].mxu0 %v794_v38  ;;  %v1241_v38 = vld [vmem:[%s2140_s7] ss:$0 sm:$0xff] }
 0x14b   : > { %1442 = vmatpush3.bf16.msra.mxu0 %v1988_v29  ;;  %1369 = vmatprep.mubr.f32.mxu0 %v483_v44  ;;  %v808_v29 = vld [vmem:[#allocation2 + $0x68] sm:$0xff] }
 0x14c   : > { %1444 = vmatprep.subr.bf16.mxu0 %v1443_v37  ;;  %v1463_v48 = vpack.c.bf16 %v808_v29, %v807_v45  ;;  %1494 = vmatpush3.bf16.msra.mxu1 %v1491_v16 }
 0x14d   : > { %1496 = vmatprep.subr.bf16.mxu1 %v1495_v19 }
 0x14f   : > { %1446 = vmatpush3.bf16.msra.mxu0 %v1443_v37 }
 0x150   : > { %1448 = vmatprep.subr.bf16.mxu0 %v1447_v46  ;;  %1498 = vmatpush3.bf16.msra.mxu1 %v1495_v19 }
 0x151   : > { %1500 = vmatprep.subr.bf16.mxu1 %v1499_v20 }
 0x153   : > { %1450 = vmatpush3.bf16.msra.mxu0 %v1447_v46 }
 0x154   : > { %1452 = vmatprep.subr.bf16.mxu0 %v1451_v50  ;;  %1502 = vmatpush3.bf16.msra.mxu1 %v1499_v20 }
 0x157   : > { %1454 = vmatpush3.bf16.msra.mxu0 %v1451_v50 }
 0x158   : > { %1456 = vmatprep.subr.bf16.mxu0 %v1455_v53 }
 0x15b   : > { %1458 = vmatpush3.bf16.msra.mxu0 %v1455_v53 }
 0x15c   : > { %1460 = vmatprep.subr.bf16.mxu0 %v1459_v34 }
 0x15f   : > { %1462 = vmatpush3.bf16.msra.mxu0 %v1459_v34 }
 0x160   : > { %1464 = vmatprep.subr.bf16.mxu0 %v1463_v48 }
 0x163   : > { %1466 = vmatpush3.bf16.msra.mxu0 %v1463_v48 }
 0x164   : > { %1468 = vmatprep.subr.bf16.mxu0 %v1467_v62 }
 0x167   : > { %1470 = vmatpush3.bf16.msra.mxu0 %v1467_v62 }
 0x16a   : > { %1370 = vmatmul.mubr.f32.vlgmr.msra.gmra.mrb[0].mxu0 %v586_v63 }
 0x23d   : > { %v1371_v22 = vpop.f32.mrb[0].mxu0 }
 0x23e   : > { %v985_v23 = vadd.f32 %v1371_v22, %v1238_v21  ;;  %v968_v24 = vpop.f32.mrb[1].mxu0 }
 0x23f   : > { %v984_v25 = vadd.f32 %v1238_v21, %v968_v24 }
 0x240   : > { %v1240_v26 = vmul.f32 -1.442695, %v985_v23 }
 0x241   : > { %v1239_v27 = vmul.f32 -1.442695, %v984_v25 }
 0x242   : > { %1603 = vpow2.f32 %v1240_v26 }
 0x243   : > { %1605 = vpow2.f32 %v1239_v27 }
 0x24c   : > { %v1604_v28 = vpop.eup %1603 }
 0x24d   : > { %v1606_v30 = vpop.eup %1605  ;;  %v993_v31 = vadd.f32 1.0, %v1604_v28 }
 0x24e   : > { %v992_v32 = vadd.f32 1.0, %v1606_v30 }
 0x24f   : > { %1607 = vrcp.f32 %v993_v31 }
 0x250   : > { %1609 = vrcp.f32 %v992_v32 }
 0x259   : > { %v1608_v33 = vpop.eup %1607 }
 0x25a   : > { %v1610_v35 = vpop.eup %1609  ;;  %v999_v37 = vmul.f32 %v1608_v33, %v985_v23 }
 0x25b   : > { %v998_v36 = vmul.f32 %v1610_v35, %v984_v25 }
 0x25d   : > { %1404 = vmatprep.mubr.f32.mxu1 %v998_v36 }
 0x25e   : > { %1405 = vmatmul.mubr.f32.vlgmr.msra.gmra.mrb[0].mxu1 %v999_v37 }
 0x331   : > { %v1406_v41 = vpop.f32.mrb[0].mxu1 }
 0x332   : > { %v1095_v42 = vadd.f32 %v1406_v41, %v1241_v38  ;;  %v1089_v44 = vpop.f32.mrb[1].mxu1 }
 0x333   : > { %v1090_v46 = vadd.f32 %v1241_v38, %v1089_v44 }
 0x334   : > { %1099 = vst [vmem:[%s343_s22 + $0x8] sm:$0xff] %v1095_v42 }
 0x335   : > { %1098 = vst [vmem:[%s343_s22] sm:$0xff] %v1090_v46 }
 0x336   : > { %1708 = shalt.err (!%p1705_p9)
}
 0x337   : > { %s1709_s16 = scalar_lea.hbm %s2090_s18, 256  ;;  %s1713_s21 = scalar_lea.hbm %s2141_s8, 512 }
 0x338   : > { %p1710_p2 = scmp.ne.s32.totalorder %s2090_s18, %s1709_s16  ;;  %p1714_p5 = scmp.lt.u32.totalorder %s2090_s18, %s2141_s8 }
 0x339   : > { %p1715_p10 = scmp.lt.u32.totalorder %s1713_s21, %s1709_s16  ;;  %p1717_p4 = scmp.lt.u32.totalorder %s1709_s16, %s2090_s18 }
 0x33a   : > { %p1711_p0 = pnand %p1710_p2, %p2163_p7 }
 0x33b   : > { %p1716_p12 = por %p1715_p10, %p1714_p5 }
 0x33c   : > { %p1712_p3 = pneg %p1711_p0 }
 0x33d   : > { %p1718_p8 = por %p1717_p4, %p1716_p12 }
 0x33f   : > { %p1719_p11 = pnand %p1718_p8, %p1712_p3 }
 0x341   : > { %1722 = shalt.err (!%p1719_p11)
}
 0x342   : > { %s1780_s19 = smov 128   ;;  %s1781_s22 = smov 8  }
 0x343   : > { %1525 = dma.vmem_to_hbm [thread:$0]  (%p2163_p7), %s2085_s29, 256, %s2090_s18, %s2092_s26, %s1780_s19, %s1780_s19, %s1781_s22  }
 0x344 PF: > { %s2164_s20 = sld [smem:[#allocation15_spill]]  ;;  %p1547_p13 = scmp.ge.s32.totalorder %s1765_s30, 2 }
 0x345   : > { %s1129_s17 = sand.u32 1, %s1753_s27  }
 0x346   : > { %s1130_s24 = scalar_lea.sflag [#allocation4], %s1129_s17 }
 0x34a   : > { %p2165_p1 = scmp.ne.s32.totalorder %s2164_s20, 0 }
 0x34c   : > { %p1538_p6 = pnand %p1547_p13, %p2165_p1 }
 0x34e   : > { %1748 = dma.done.wait (!%p1538_p6), %s1130_s24, 256  }
 0x34f   : > { %1750 = vsyncadd (!%p1538_p6), %s1130_s24, 4294967040  ;;  %s2166_s30 = sld [smem:[#allocation13_spill]]  ;;  %s2167_s10 = sld [smem:[#allocation12_spill]] }
 0x350   : > { %s2168_s29 = sld [smem:[#allocation14_spill]]  ;;  %s2169_s27 = smov %s1757_s28 }
 0x355   : > { %p20_p9 = scmp.ge.s32.totalorder %s2166_s30, 4   ;;  %s2170_s28 = smov %s2167_s10 }
 0x357   :  { %22 = sbr.rel (!%p20_p9) target bundleno = 5 (0x5), region = 100 }
 0x35e   :  { %1135 = vsyncpa [#allocation3], 1 }
 0x35f   :  { %1137 = vsyncpa [#allocation3 + $0x1], 1 }
 0x360   :  { %1138 = vsyncpa [#allocation6], 1 }
 0x361   :  { %1139 = vsyncpa [#allocation4], 1 }
 0x362   :  { %1141 = vsyncpa [#allocation4 + $0x1], 1 }

</bundles_post_ra>
